<compile_context>
chip_gen: v5e
topology: v5e:2x2
jax: 0.10.0
libtpu: 0.0.40
codegen_flags: <defaults>
</compile_context>

<pallas_src>
import functools

import jax
import jax.numpy as jnp
from jax.experimental import pallas as pl
from jax.experimental.pallas import tpu as pltpu


def _round_up(v, m):
    return (v + m - 1) // m * m


def _reduce_kernel(x_ref, b_ref, w1_ref, w2_ref, y_ref, sum_acc, max_acc, *,
                   num_graphs):
    step = pl.program_id(0)
    neg_inf = jnp.float32(-jnp.inf)

    @pl.when(step == 0)
    def _init():
        sum_acc[...] = jnp.zeros_like(sum_acc)
        max_acc[...] = jnp.full_like(max_acc, neg_inf)

    x = x_ref[...]                                   # [T, Cp] f32
    b = b_ref[...]                                   # [T, 1]  i32 (-1 = padding)
    tile_rows, c_pad = x.shape
    b_pad = sum_acc.shape[0]

    # ---- segment sum: one-hot matmul on the MXU (scales with num_graphs) ----
    gids = jax.lax.broadcasted_iota(jnp.int32, (tile_rows, b_pad), 1)
    mf = (b == gids).astype(jnp.float32)             # [T, Bp]
    sum_acc[...] += jax.lax.dot_general(
        mf, x, (((0,), (0,)), ((), ())), preferred_element_type=jnp.float32)

    # ---- segment max: per-graph masked max, running [Bp, Cp] accumulator ----
    # TODO(synk): for very large num_graphs switch to a tiled/sorted scatter-max.
    rows = []
    for g in range(num_graphs):
        sel = b == g                                 # [T, 1]
        rows.append(jnp.max(jnp.where(sel, x, neg_inf), axis=0, keepdims=True))
    if num_graphs < b_pad:
        rows.append(jnp.full((b_pad - num_graphs, c_pad), neg_inf, jnp.float32))
    max_acc[...] = jnp.maximum(max_acc[...], jnp.concatenate(rows, axis=0))

    # ---- finalize at the last node tile: fused MLP + sigmoid ----
    @pl.when(step == pl.num_programs(0) - 1)
    def _finalize():
        sum_res = sum_acc[...]
        # Empty graphs: max accumulator is still -inf -> zero-fill (matches ref).
        max_res = jnp.where(max_acc[...] > neg_inf, max_acc[...], 0.0)
        v = jnp.concatenate([max_res, sum_res], axis=0)            # [2Bp, Cp]
        h = jnp.maximum(
            jnp.dot(v, w1_ref[...], preferred_element_type=jnp.float32), 0.0)
        o = jnp.dot(h, w2_ref[...], preferred_element_type=jnp.float32)
        y_ref[...] = jax.nn.sigmoid(o[:b_pad] + o[b_pad:])


def _apply_kernel(x_ref, b_ref, y_ref, out_ref, *, num_graphs):
    x = x_ref[...]                                   # [T, Cp]
    b = b_ref[...]                                   # [T, 1]
    y = y_ref[...]                                   # [Bp, Cp]
    tile_rows, _ = x.shape
    b_pad = y.shape[0]

    if num_graphs <= 16:
        # Small graph count: VPU select-accumulate beats a K=B padded MXU pass.
        acc = jnp.zeros_like(x)
        for g in range(num_graphs):
            acc = acc + jnp.where(b == g, y[g:g + 1, :], 0.0)
        out_ref[...] = x * acc
    else:
        gids = jax.lax.broadcasted_iota(jnp.int32, (tile_rows, b_pad), 1)
        mf = (b == gids).astype(jnp.float32)
        out_ref[...] = x * jnp.dot(mf, y, preferred_element_type=jnp.float32)


def feature_attention(x, batch, w1, w2, num_graphs, *, tile_rows=512):
    """x: [N, C] f32, batch: [N] i32, w1: [C, C//r], w2: [C//r, C]."""
    n, c = x.shape
    c_in, cr = w1.shape
    assert c_in == c and w2.shape == (cr, c)

    c_pad = _round_up(c, 128)                        # lane-dense channels
    cr_pad = _round_up(cr, 128)
    b_pad = _round_up(num_graphs, 8)
    t = min(tile_rows, _round_up(n, 8))              # node-tile rows
    n_pad = _round_up(n, t)

    x_p = jnp.zeros((n_pad, c_pad), jnp.float32).at[:n, :c].set(
        x.astype(jnp.float32))
    # Padded nodes get graph id -1 so they match no graph (no sum/max pollution).
    b_p = jnp.full((n_pad, 1), -1, jnp.int32).at[:n, 0].set(
        batch.astype(jnp.int32))
    w1_p = jnp.zeros((c_pad, cr_pad), jnp.float32).at[:c, :cr].set(
        w1.astype(jnp.float32))
    w2_p = jnp.zeros((cr_pad, c_pad), jnp.float32).at[:cr, :c].set(
        w2.astype(jnp.float32))

    grid = (n_pad // t,)
    vmem_limit = 32 * 1024 * 1024                    # explicit; safe on v5e/v6e/v7x

    # -------- pass 1: segment reduce + MLP + sigmoid -> y [Bp, Cp] --------
    reduce_k = functools.partial(_reduce_kernel, num_graphs=num_graphs)
    y = pl.pallas_call(
        reduce_k,
        out_shape=jax.ShapeDtypeStruct((b_pad, c_pad), jnp.float32),
        grid_spec=pltpu.PrefetchScalarGridSpec(
            num_scalar_prefetch=0,
            grid=grid,
            in_specs=[
                pl.BlockSpec((t, c_pad), lambda i: (i, 0)),       # x tile
                pl.BlockSpec((t, 1), lambda i: (i, 0)),           # batch tile
                pl.BlockSpec((c_pad, cr_pad), lambda i: (0, 0)),  # w1 (resident)
                pl.BlockSpec((cr_pad, c_pad), lambda i: (0, 0)),  # w2 (resident)
            ],
            out_specs=pl.BlockSpec((b_pad, c_pad), lambda i: (0, 0)),
            scratch_shapes=[
                pltpu.VMEM((b_pad, c_pad), jnp.float32),          # sum accumulator
                pltpu.VMEM((b_pad, c_pad), jnp.float32),          # max accumulator
            ],
        ),
        compiler_params=pltpu.CompilerParams(
            dimension_semantics=("arbitrary",),       # carried reduction
            vmem_limit_bytes=vmem_limit,
        ),
    )(x_p, b_p, w1_p, w2_p)

    # -------- pass 2: out = x * y[batch] --------
    apply_k = functools.partial(_apply_kernel, num_graphs=num_graphs)
    out = pl.pallas_call(
        apply_k,
        out_shape=jax.ShapeDtypeStruct((n_pad, c_pad), jnp.float32),
        grid_spec=pltpu.PrefetchScalarGridSpec(
            num_scalar_prefetch=0,
            grid=grid,
            in_specs=[
                pl.BlockSpec((t, c_pad), lambda i: (i, 0)),       # x tile
                pl.BlockSpec((t, 1), lambda i: (i, 0)),           # batch tile
                pl.BlockSpec((b_pad, c_pad), lambda i: (0, 0)),   # y (resident)
            ],
            out_specs=pl.BlockSpec((t, c_pad), lambda i: (i, 0)),
        ),
        compiler_params=pltpu.CompilerParams(
            dimension_semantics=("parallel",),        # independent tiles (2 TCs on v7x)
            vmem_limit_bytes=vmem_limit,
        ),
    )(x_p, b_p, y)

    return out[:n, :c]


def feature_attention_ref(x, batch, w1, w2, num_graphs):
    """Pure-JAX reference mirroring the PyTorch forward."""
    sum_res = jax.ops.segment_sum(x, batch, num_segments=num_graphs)
    max_res = jax.ops.segment_max(x, batch, num_segments=num_graphs)
    max_res = jnp.where(jnp.isfinite(max_res), max_res, 0.0)

    def mlp(v):
        return jnp.maximum(v @ w1, 0.0) @ w2

    y = jax.nn.sigmoid(mlp(max_res) + mlp(sum_res))
    return x * y[batch]


if __name__ == "__main__":
    # Small shapes consistent with the module: N=8 nodes, C=32 channels,
    # reduction=4, B=2 graphs.
    N, C, reduction, B = 8, 32, 4, 2
    Cr = C // reduction

    key = jax.random.PRNGKey(0)
    kx, kw1, kw2 = jax.random.split(key, 3)

    x = jax.random.normal(kx, (N, C), dtype=jnp.float32)
    batch = jnp.array([0, 0, 0, 0, 1, 1, 1, 1], dtype=jnp.int32)

    # Deterministic Linear-like init (no bias), stored pre-transposed for the kernel.
    w1 = (jax.random.uniform(kw1, (C, Cr), dtype=jnp.float32) - 0.5) * (2.0 / jnp.sqrt(C))
    w2 = (jax.random.uniform(kw2, (Cr, C), dtype=jnp.float32) - 0.5) * (2.0 / jnp.sqrt(Cr))

    out = feature_attention(x, batch, w1, w2, B)
    out = jax.block_until_ready(out)

    ref = feature_attention_ref(x, batch, w1, w2, B)
    assert out.shape == (N, C)
    assert jnp.allclose(out, ref, atol=1e-5, rtol=1e-5), "mismatch vs reference"

    print("KERNEL_OK")
</pallas_src>

<mosaic_0001>
module attributes {stable_mosaic.version = 11 : i64} {
  func.func @_reduce_kernel(%arg0: i32, %arg1: memref<8x128xf32, #tpu.memory_space<vmem>>, %arg2: memref<8x1xi32, #tpu.memory_space<vmem>>, %arg3: memref<128x128xf32, #tpu.memory_space<vmem>>, %arg4: memref<128x128xf32, #tpu.memory_space<vmem>>, %arg5: memref<8x128xf32, #tpu.memory_space<vmem>>, %arg6: memref<8x128xf32, #tpu.memory_space<vmem>>, %arg7: memref<8x128xf32, #tpu.memory_space<vmem>>) attributes {dimension_semantics = [#tpu.dimension_semantics<arbitrary>], iteration_bounds = array<i64: 1>, scalar_prefetch = 0 : i64, scratch_operands = 2 : i64, tpu.core_type = #tpu.core_type<tc>, window_params = [{transform_indices = @transform_0, window_bounds = array<i64: 8, 128>}, {transform_indices = @transform_1, window_bounds = array<i64: 8, 1>}, {pipeline_mode = #tpu.pipeline_mode<synchronous>, transform_indices = @transform_2, window_bounds = array<i64: 128, 128>}, {pipeline_mode = #tpu.pipeline_mode<synchronous>, transform_indices = @transform_3, window_bounds = array<i64: 128, 128>}, {pipeline_mode = #tpu.pipeline_mode<synchronous>, transform_indices = @transform_4, window_bounds = array<i64: 8, 128>}]} {
    %c0_i32 = arith.constant 0 : i32
    %0 = arith.cmpi eq, %arg0, %c0_i32 : i32
    %1 = arith.extui %0 : i1 to i32
    %cst = arith.constant 0xFF800000 : f32
    %c0_i32_0 = arith.constant 0 : i32
    %2 = arith.cmpi ne, %1, %c0_i32_0 : i32
    scf.if %2 {
      %cst_22 = arith.constant 0.000000e+00 : f32
      %38 = vector.broadcast %cst_22 : f32 to vector<8x128xf32>
      %c0_23 = arith.constant 0 : index
      %c0_24 = arith.constant 0 : index
      %39 = vector.load %arg6[%c0_23, %c0_24] : memref<8x128xf32, #tpu.memory_space<vmem>>, vector<8x128xf32>
      tpu.vector_store %arg6[%c0_23, %c0_24], %38 {strides = array<i32>} : memref<8x128xf32, #tpu.memory_space<vmem>>, vector<8x128xf32>,
      %40 = vector.broadcast %cst : f32 to vector<8x128xf32>
      %c0_25 = arith.constant 0 : index
      %c0_26 = arith.constant 0 : index
      %41 = vector.load %arg7[%c0_25, %c0_26] : memref<8x128xf32, #tpu.memory_space<vmem>>, vector<8x128xf32>
      tpu.vector_store %arg7[%c0_25, %c0_26], %40 {strides = array<i32>} : memref<8x128xf32, #tpu.memory_space<vmem>>, vector<8x128xf32>,
    } else {
    }
    %c0 = arith.constant 0 : index
    %c0_1 = arith.constant 0 : index
    %3 = vector.load %arg1[%c0, %c0_1] : memref<8x128xf32, #tpu.memory_space<vmem>>, vector<8x128xf32>
    %c0_2 = arith.constant 0 : index
    %c0_3 = arith.constant 0 : index
    %4 = vector.load %arg2[%c0_2, %c0_3] : memref<8x1xi32, #tpu.memory_space<vmem>>, vector<8x1xi32>
    %5 = tpu.iota {dimensions = array<i32: 1>} : vector<8x8xi32>
    %6 = vector.broadcast %4 : vector<8x1xi32> to vector<8x8xi32>
    %7 = arith.cmpi eq, %6, %5 : vector<8x8xi32>
    %8 = arith.extui %7 : vector<8x8xi1> to vector<8x8xi32>
    %9 = arith.sitofp %8 : vector<8x8xi32> to vector<8x8xf32>
    %c0_4 = arith.constant 0 : index
    %c0_5 = arith.constant 0 : index
    %10 = vector.load %arg6[%c0_4, %c0_5] : memref<8x128xf32, #tpu.memory_space<vmem>>, vector<8x128xf32>
    %cst_6 = arith.constant dense<0.000000e+00> : vector<8x128xf32>
    %11 = tpu.matmul %9, %3, %cst_6 {dimension_numbers = #tpu.dot_dimension_numbers<[0], [0], [1], [1], [0, 1, 1, 1], [], []>} : vector<8x8xf32>, vector<8x128xf32>, vector<8x128xf32> -> vector<8x128xf32>
    %12 = arith.addf %10, %11 : vector<8x128xf32>
    %c0_7 = arith.constant 0 : index
    %c0_8 = arith.constant 0 : index
    %13 = vector.load %arg6[%c0_7, %c0_8] : memref<8x128xf32, #tpu.memory_space<vmem>>, vector<8x128xf32>
    tpu.vector_store %arg6[%c0_7, %c0_8], %12 {strides = array<i32>} : memref<8x128xf32, #tpu.memory_space<vmem>>, vector<8x128xf32>,
    %c0_i32_9 = arith.constant 0 : i32
    %14 = vector.broadcast %c0_i32_9 : i32 to vector<8x1xi32>
    %15 = arith.cmpi eq, %4, %14 : vector<8x1xi32>
    %cst_10 = arith.constant 0xFF800000 : f32
    %16 = vector.shape_cast %15 : vector<8x1xi1> to vector<8x1xi1>
    %17 = vector.broadcast %16 : vector<8x1xi1> to vector<8x128xi1>
    %18 = vector.broadcast %cst_10 : f32 to vector<8x128xf32>
    %19 = arith.select %17, %3, %18 : vector<8x128xi1>, vector<8x128xf32>
    %cst_11 = arith.constant dense<0xFF800000> : vector<128xf32>
    %20 = vector.multi_reduction <maximumf>, %19, %cst_11 [0] : vector<8x128xf32> to vector<128xf32>
    %21 = vector.shape_cast %20 : vector<128xf32> to vector<1x128xf32>
    %c1_i32 = arith.constant 1 : i32
    %22 = vector.broadcast %c1_i32 : i32 to vector<8x1xi32>
    %23 = arith.cmpi eq, %4, %22 : vector<8x1xi32>
    %cst_12 = arith.constant 0xFF800000 : f32
    %24 = vector.shape_cast %23 : vector<8x1xi1> to vector<8x1xi1>
    %25 = vector.broadcast %24 : vector<8x1xi1> to vector<8x128xi1>
    %26 = vector.broadcast %cst_12 : f32 to vector<8x128xf32>
    %27 = arith.select %25, %3, %26 : vector<8x128xi1>, vector<8x128xf32>
    %cst_13 = arith.constant dense<0xFF800000> : vector<128xf32>
    %28 = vector.multi_reduction <maximumf>, %27, %cst_13 [0] : vector<8x128xf32> to vector<128xf32>
    %29 = vector.shape_cast %28 : vector<128xf32> to vector<1x128xf32>
    %cst_14 = arith.constant 0xFF800000 : f32
    %30 = vector.broadcast %cst_14 : f32 to vector<6x128xf32>
    %c0_15 = arith.constant 0 : index
    %c0_16 = arith.constant 0 : index
    %31 = vector.load %arg7[%c0_15, %c0_16] : memref<8x128xf32, #tpu.memory_space<vmem>>, vector<8x128xf32>
    %32 = tpu.concatenate %21, %29, %30 in 0 : vector<1x128xf32>, vector<1x128xf32>, vector<6x128xf32> -> vector<8x128xf32>
    %33 = arith.maximumf %31, %32 : vector<8x128xf32>
    %c0_17 = arith.constant 0 : index
    %c0_18 = arith.constant 0 : index
    %34 = vector.load %arg7[%c0_17, %c0_18] : memref<8x128xf32, #tpu.memory_space<vmem>>, vector<8x128xf32>
    tpu.vector_store %arg7[%c0_17, %c0_18], %33 {strides = array<i32>} : memref<8x128xf32, #tpu.memory_space<vmem>>, vector<8x128xf32>,
    %c0_i32_19 = arith.constant 0 : i32
    %35 = arith.cmpi eq, %arg0, %c0_i32_19 : i32
    %36 = arith.extui %35 : i1 to i32
    %cst_20 = arith.constant 0xFF800000 : f32
    %c0_i32_21 = arith.constant 0 : i32
    %37 = arith.cmpi ne, %36, %c0_i32_21 : i32
    scf.if %37 {
      %c0_22 = arith.constant 0 : index
      %c0_23 = arith.constant 0 : index
      %38 = vector.load %arg6[%c0_22, %c0_23] : memref<8x128xf32, #tpu.memory_space<vmem>>, vector<8x128xf32>
      %c0_24 = arith.constant 0 : index
      %c0_25 = arith.constant 0 : index
      %39 = vector.load %arg7[%c0_24, %c0_25] : memref<8x128xf32, #tpu.memory_space<vmem>>, vector<8x128xf32>
      %40 = vector.broadcast %cst_20 : f32 to vector<8x128xf32>
      %41 = arith.cmpf ogt, %39, %40 : vector<8x128xf32>
      %c0_26 = arith.constant 0 : index
      %c0_27 = arith.constant 0 : index
      %42 = vector.load %arg7[%c0_26, %c0_27] : memref<8x128xf32, #tpu.memory_space<vmem>>, vector<8x128xf32>
      %cst_28 = arith.constant 0.000000e+00 : f32
      %43 = vector.broadcast %cst_28 : f32 to vector<8x128xf32>
      %44 = arith.select %41, %42, %43 : vector<8x128xi1>, vector<8x128xf32>
      %45 = tpu.concatenate %44, %38 in 0 : vector<8x128xf32>, vector<8x128xf32> -> vector<16x128xf32>
      %c0_29 = arith.constant 0 : index
      %c0_30 = arith.constant 0 : index
      %46 = vector.load %arg3[%c0_29, %c0_30] : memref<128x128xf32, #tpu.memory_space<vmem>>, vector<128x128xf32>
      %cst_31 = arith.constant dense<0.000000e+00> : vector<16x128xf32>
      %47 = tpu.matmul %45, %46, %cst_31 {dimension_numbers = #tpu.dot_dimension_numbers<[1], [0], [0], [1], [0, 0, 1, 1], [], []>} : vector<16x128xf32>, vector<128x128xf32>, vector<16x128xf32> -> vector<16x128xf32>
      %cst_32 = arith.constant 0.000000e+00 : f32
      %48 = vector.broadcast %cst_32 : f32 to vector<16x128xf32>
      %49 = arith.maximumf %47, %48 : vector<16x128xf32>
      %c0_33 = arith.constant 0 : index
      %c0_34 = arith.constant 0 : index
      %50 = vector.load %arg4[%c0_33, %c0_34] : memref<128x128xf32, #tpu.memory_space<vmem>>, vector<128x128xf32>
      %cst_35 = arith.constant dense<0.000000e+00> : vector<16x128xf32>
      %51 = tpu.matmul %49, %50, %cst_35 {dimension_numbers = #tpu.dot_dimension_numbers<[1], [0], [0], [1], [0, 0, 1, 1], [], []>} : vector<16x128xf32>, vector<128x128xf32>, vector<16x128xf32> -> vector<16x128xf32>
      %52 = vector.extract_strided_slice %51 {offsets = [0, 0], sizes = [8, 128], strides = [1, 1]} : vector<16x128xf32> to vector<8x128xf32>
      %53 = vector.extract_strided_slice %51 {offsets = [8, 0], sizes = [8, 128], strides = [1, 1]} : vector<16x128xf32> to vector<8x128xf32>
      %54 = arith.addf %52, %53 : vector<8x128xf32>
      %55 = arith.negf %54 : vector<8x128xf32>
      %56 = math.exp %55 : vector<8x128xf32>
      %cst_36 = arith.constant 1.000000e+00 : f32
      %57 = vector.broadcast %cst_36 : f32 to vector<8x128xf32>
      %58 = arith.addf %57, %56 : vector<8x128xf32>
      %59 = arith.divf %57, %58 : vector<8x128xf32>
      %c0_37 = arith.constant 0 : index
      %c0_38 = arith.constant 0 : index
      %60 = vector.load %arg5[%c0_37, %c0_38] : memref<8x128xf32, #tpu.memory_space<vmem>>, vector<8x128xf32>
      tpu.vector_store %arg5[%c0_37, %c0_38], %59 {strides = array<i32>} : memref<8x128xf32, #tpu.memory_space<vmem>>, vector<8x128xf32>,
    } else {
    }
    return
  }
  func.func @transform_0(%arg0: i32) -> (i32, i32) {
    %c0_i32 = arith.constant 0 : i32
    %c0_i32_0 = arith.constant 0 : i32
    return %arg0, %c0_i32 : i32, i32
  }
  func.func @transform_1(%arg0: i32) -> (i32, i32) {
    %c0_i32 = arith.constant 0 : i32
    %c0_i32_0 = arith.constant 0 : i32
    return %arg0, %c0_i32 : i32, i32
  }
  func.func @transform_2(%arg0: i32) -> (i32, i32) {
    %c0_i32 = arith.constant 0 : i32
    %c0_i32_0 = arith.constant 0 : i32
    %c0_i32_1 = arith.constant 0 : i32
    return %c0_i32, %c0_i32_0 : i32, i32
  }
  func.func @transform_3(%arg0: i32) -> (i32, i32) {
    %c0_i32 = arith.constant 0 : i32
    %c0_i32_0 = arith.constant 0 : i32
    %c0_i32_1 = arith.constant 0 : i32
    return %c0_i32, %c0_i32_0 : i32, i32
  }
  func.func @transform_4(%arg0: i32) -> (i32, i32) {
    %c0_i32 = arith.constant 0 : i32
    %c0_i32_0 = arith.constant 0 : i32
    %c0_i32_1 = arith.constant 0 : i32
    return %c0_i32, %c0_i32_0 : i32, i32
  }
}

</mosaic_0001>

<bundles_post_ra>
// kernel: tpu_custom_call.1
= control target key start
LH: loop header
LB: loop body
LE: loop exit
PB: predicated region body
PF: predicated region fallthrough
CT: control target
= control target key end

     0   :  { %9 = vsyncpa [#allocation5], 0  ;;  %s458_s0 = inlined_call_operand.vmem [shape: f32[8,128], index: 0, kind: input, shape index: {}]   ;;  %s459_s1 = inlined_call_operand.vmem [shape: s32[8,1], index: 1, kind: input, shape index: {}]   ;;  %s460_s2 = inlined_call_operand.hbm [shape: f32[128,128], index: 2, kind: input, shape index: {}]   ;;  %s461_s3 = inlined_call_operand.hbm [shape: f32[128,128], index: 3, kind: input, shape index: {}]   ;;  %s462_s4 = inlined_call_operand.hbm [shape: f32[8,128], index: 4, kind: output, shape index: {}]  }
   0x1   :  { %10 = vsyncpa [#allocation8], 0 }
   0x2   :  { %11 = vsyncpa [#allocation6], 0  ;;  %s20_s17 = sshll.u32 %s460_s2, 4  ;;  %s411_s18 = smov [#allocation4]   ;;  %s21_s17 = int_to_ptr.hbm [resolvable:$true] %s20_s17 }
   0x3   :  { %s22_s19 = sshll.u32 %s411_s18, 4  ;;  %s33_s22 = sshll.u32 %s461_s3, 4  ;;  %s23_s19 = int_to_ptr.vmem [resolvable:$true] %s22_s19  ;;  %s34_s22 = int_to_ptr.hbm [resolvable:$true] %s33_s22 }
   0x4   :  { %s412_s23 = smov 128   ;;  %s413_s24 = smov 8  }
   0x5   :  { %28 = dma.hbm_to_vmem [thread:$0]  %s21_s17, 2048, %s23_s19, [#allocation5], %s412_s23, %s412_s23, %s413_s24  }
   0x6   :  { %s414_s25 = smov [#allocation7]  }
   0x7   :  { %s35_s26 = sshll.u32 %s414_s25, 4  ;;  %s36_s26 = int_to_ptr.vmem [resolvable:$true] %s35_s26 }
   0x8   :  { %41 = dma.hbm_to_vmem [thread:$0]  %s34_s22, 2048, %s36_s26, [#allocation8], %s412_s23, %s412_s23, %s413_s24  }
   0x9   :  { %405 = dma.done.wait [#allocation5], 2048  }
   0xa   :  { %406 = vsyncadd [#allocation5], 4294965248 }
   0xb   :  { %407 = dma.done.wait [#allocation8], 2048  }
   0xc   :  { %408 = vsyncadd [#allocation8], 4294965248  ;;  %v415_v0 = vmov 0   ;;  %v57_v1 = vld [vmem:[%s459_s1] sm:$0xff]  ;;  %v58_v4 = vlaneseq  ;;  %v416_v7 = vmov 0.0   ;;  %v180_v10 = vld [vmem:[#allocation4 + $0x78] sm:$0xff] }
   0xd   :  { %327 = vset.pattern.permute.xlu0 %v415_v0  ;;  %328 = vset.pattern.permute.xlu1 %v415_v0  ;;  %vm125_vm0 = vcmp.eq.s32.totalorder %v57_v1, 0  ;;  %vm138_vm1 = vcmp.eq.s32.totalorder %v57_v1, 1  ;;  %v56_v9 = vld [vmem:[%s458_s0] sm:$0xff]  ;;  %v179_v11 = vld [vmem:[#allocation4 + $0x70] sm:$0xff]  ;;  %v178_v13 = vld [vmem:[#allocation4 + $0x68] sm:$0xff]  ;;  %vm152_vm5 = vcmask 1040384  }
   0xe   :  { %61 = vperm.xlu0 %327, %v57_v1   ;;  %v126_v2 = vsel %vm125_vm0, 1, %v415_v0  ;;  %v139_v3 = vsel %vm138_vm1, 1, %v415_v0  ;;  %v59_v5 = vand.u32 127, %v58_v4  ;;  %118 = vmatpush.msra.mxu0 %v56_v9  ;;  %v177_v16 = vld [vmem:[#allocation4 + $0x60] sm:$0xff]  ;;  %v176_v18 = vld [vmem:[#allocation4 + $0x58] sm:$0xff]  ;;  %v175_v20 = vld [vmem:[#allocation4 + $0x50] sm:$0xff] }
   0xf   :  { %128 = vperm.xlu1 %328, %v126_v2   ;;  %181 = vmatpush.msra.mxu1 %v180_v10  ;;  %v174_v22 = vld [vmem:[#allocation4 + $0x48] sm:$0xff]  ;;  %v173_v26 = vld [vmem:[#allocation4 + $0x40] sm:$0xff]  ;;  %v172_v28 = vld [vmem:[#allocation4 + $0x38] sm:$0xff]  ;;  %vm154_vm6 = vcmask 1041408   ;;  %vm99_vm7 = vcmask 64512   ;;  %s417_s0 = smov [#allocation9]  }
  0x10   :  { %288 = vmatpush.msra.mxu3 %v180_v10  ;;  %v171_v31 = vld [vmem:[#allocation4 + $0x30] sm:$0xff]  ;;  %v170_v33 = vld [vmem:[#allocation4 + $0x28] sm:$0xff]  ;;  %v169_v36 = vld [vmem:[#allocation4 + $0x20] sm:$0xff]  ;;  %s271_s1 = sshll.u32 %s417_s0, 4  ;;  %s273_s5 = sshll.u32 %s462_s4, 4  ;;  %s272_s1 = int_to_ptr.vmem [resolvable:$true] %s271_s1  ;;  %s274_s5 = int_to_ptr.hbm [resolvable:$true] %s273_s5 }
  0x11   :  { %182 = vmatpush.msra.mxu1 %v179_v11  ;;  %v168_v38 = vld [vmem:[#allocation4 + $0x18] sm:$0xff]  ;;  %v167_v40 = vld [vmem:[#allocation4 + $0x10] sm:$0xff]  ;;  %v166_v41 = vld [vmem:[#allocation4 + $0x8] sm:$0xff] }
  0x12   :  { %289 = vmatpush.msra.mxu3 %v179_v11  ;;  %v165_v43 = vld [vmem:[#allocation4] sm:$0xff]  ;;  %v221_v45 = vld [vmem:[#allocation7 + $0x78] sm:$0xff]  ;;  %v220_v46 = vld [vmem:[#allocation7 + $0x70] sm:$0xff] }
  0x13   :  { %183 = vmatpush.msra.mxu1 %v178_v13  ;;  %222 = vmatpush.msrb.mxu0 %v221_v45  ;;  %v219_v47 = vld [vmem:[#allocation7 + $0x68] sm:$0xff]  ;;  %v218_v48 = vld [vmem:[#allocation7 + $0x60] sm:$0xff]  ;;  %v217_v49 = vld [vmem:[#allocation7 + $0x58] sm:$0xff] }
  0x14   :  { %290 = vmatpush.msra.mxu3 %v178_v13  ;;  %304 = vmatpush.msra.mxu2 %v221_v45  ;;  %v216_v50 = vld [vmem:[#allocation7 + $0x50] sm:$0xff]  ;;  %v215_v51 = vld [vmem:[#allocation7 + $0x48] sm:$0xff]  ;;  %v214_v52 = vld [vmem:[#allocation7 + $0x40] sm:$0xff] }
  0x15   :  { %184 = vmatpush.msra.mxu1 %v177_v16  ;;  %223 = vmatpush.msrb.mxu0 %v220_v46  ;;  %v213_v53 = vld [vmem:[#allocation7 + $0x38] sm:$0xff]  ;;  %v212_v54 = vld [vmem:[#allocation7 + $0x30] sm:$0xff]  ;;  %v211_v55 = vld [vmem:[#allocation7 + $0x28] sm:$0xff] }
  0x16   :  { %291 = vmatpush.msra.mxu3 %v177_v16  ;;  %305 = vmatpush.msra.mxu2 %v220_v46  ;;  %v210_v56 = vld [vmem:[#allocation7 + $0x20] sm:$0xff]  ;;  %v209_v57 = vld [vmem:[#allocation7 + $0x18] sm:$0xff]  ;;  %v208_v58 = vld [vmem:[#allocation7 + $0x10] sm:$0xff] }
  0x17   :  { %141 = vperm.xlu1 %328, %v139_v3   ;;  %185 = vmatpush.msra.mxu1 %v176_v18  ;;  %v207_v59 = vld [vmem:[#allocation7 + $0x8] sm:$0xff]  ;;  %v206_v60 = vld [vmem:[#allocation7] sm:$0xff] }
  0x18   :  { %292 = vmatpush.msra.mxu3 %v176_v18  ;;  %224 = vmatpush.msrb.mxu0 %v219_v47 }
  0x19   :  { %186 = vmatpush.msra.mxu1 %v175_v20  ;;  %306 = vmatpush.msra.mxu2 %v219_v47 }
  0x1a   :  { %293 = vmatpush.msra.mxu3 %v175_v20  ;;  %225 = vmatpush.msrb.mxu0 %v218_v48 }
  0x1b   :  { %187 = vmatpush.msra.mxu1 %v174_v22  ;;  %307 = vmatpush.msra.mxu2 %v218_v48 }
  0x1c   :  { %294 = vmatpush.msra.mxu3 %v174_v22  ;;  %226 = vmatpush.msrb.mxu0 %v217_v49 }
  0x1d   :  { %188 = vmatpush.msra.mxu1 %v173_v26  ;;  %308 = vmatpush.msra.mxu2 %v217_v49 }
  0x1e   :  { %295 = vmatpush.msra.mxu3 %v173_v26  ;;  %227 = vmatpush.msrb.mxu0 %v216_v50 }
  0x1f   :  { %189 = vmatpush.msra.mxu1 %v172_v28  ;;  %309 = vmatpush.msra.mxu2 %v216_v50 }
  0x20   :  { %296 = vmatpush.msra.mxu3 %v172_v28  ;;  %228 = vmatpush.msrb.mxu0 %v215_v51 }
  0x21   :  { %190 = vmatpush.msra.mxu1 %v171_v31  ;;  %310 = vmatpush.msra.mxu2 %v215_v51 }
  0x22   :  { %297 = vmatpush.msra.mxu3 %v171_v31  ;;  %229 = vmatpush.msrb.mxu0 %v214_v52 }
  0x23   :  { %191 = vmatpush.msra.mxu1 %v170_v33  ;;  %311 = vmatpush.msra.mxu2 %v214_v52 }
  0x24   :  { %298 = vmatpush.msra.mxu3 %v170_v33  ;;  %230 = vmatpush.msrb.mxu0 %v213_v53 }
  0x25   :  { %192 = vmatpush.msra.mxu1 %v169_v36  ;;  %312 = vmatpush.msra.mxu2 %v213_v53 }
  0x26   :  { %299 = vmatpush.msra.mxu3 %v169_v36  ;;  %231 = vmatpush.msrb.mxu0 %v212_v54 }
  0x27   :  { %193 = vmatpush.msra.mxu1 %v168_v38  ;;  %313 = vmatpush.msra.mxu2 %v212_v54 }
  0x28   :  { %300 = vmatpush.msra.mxu3 %v168_v38  ;;  %232 = vmatpush.msrb.mxu0 %v211_v55 }
  0x29   :  { %194 = vmatpush.msra.mxu1 %v167_v40  ;;  %314 = vmatpush.msra.mxu2 %v211_v55 }
  0x2a   :  { %301 = vmatpush.msra.mxu3 %v167_v40  ;;  %233 = vmatpush.msrb.mxu0 %v210_v56 }
  0x2b   :  { %195 = vmatpush.msra.mxu1 %v166_v41  ;;  %315 = vmatpush.msra.mxu2 %v210_v56 }
  0x2c   :  { %302 = vmatpush.msra.mxu3 %v166_v41  ;;  %234 = vmatpush.msrb.mxu0 %v209_v57 }
  0x2d   :  { %196 = vmatpush.msra.mxu1 %v165_v43  ;;  %316 = vmatpush.msra.mxu2 %v209_v57 }
  0x2e   :  { %303 = vmatpush.msra.mxu3 %v165_v43  ;;  %235 = vmatpush.msrb.mxu0 %v208_v58 }
  0x2f   :  { %317 = vmatpush.msra.mxu2 %v208_v58 }
  0x30   :  { %236 = vmatpush.msrb.mxu0 %v207_v59 }
  0x31   :  { %318 = vmatpush.msra.mxu2 %v207_v59 }
  0x32   :  { %237 = vmatpush.msrb.mxu0 %v206_v60 }
  0x33   :  { %319 = vmatpush.msra.mxu2 %v206_v60 }
  0x80   :  { %v62_v6 = vpop.permute.xlu0 %61 }
  0x81   :  { %vm63_vm2 = vcmp.eq.s32.totalorder %v62_v6, %v59_v5  ;;  %v129_v12 = vpop.permute.xlu1 %128 }
  0x82   :  { %v284_v8 = vsel %vm63_vm2, 1.0, %v416_v7  ;;  %vm130_vm3 = vcmp.eq.s32.totalorder %v129_v12, 1 }
  0x83   :  { %67 = vxpose.xlu0.b32.start.end [1/1] (short) (narrow) %v284_v8, 8  ;;  %v131_v14 = vsel %vm130_vm3, %v56_v9, -inf }
  0x84   :  { %v132_v15 = vrot.slane %v131_v14, 4 }
  0x86   :  { %v133_v17 = vmax.f32 %v131_v14, %v132_v15 }
  0x88   :  { %v134_v19 = vrot.slane %v133_v17, 2 }
  0x89   :  { %v142_v21 = vpop.permute.xlu1 %141 }
  0x8a   :  { %vm143_vm4 = vcmp.eq.s32.totalorder %v142_v21, 1  ;;  %v135_v24 = vmax.f32 %v133_v17, %v134_v19 }
  0x8b   :  { %v144_v23 = vsel %vm143_vm4, %v56_v9, -inf }
  0x8c   :  { %v145_v25 = vrot.slane %v144_v23, 4  ;;  %v136_v29 = vrot.slane %v135_v24, 1 }
  0x8e   :  { %v146_v27 = vmax.f32 %v144_v23, %v145_v25  ;;  %v137_v34 = vmax.f32 %v135_v24, %v136_v29 }
  0x90   :  { %v147_v30 = vrot.slane %v146_v27, 2 }
  0x92   :  { %v148_v32 = vmax.f32 %v146_v27, %v147_v30 }
  0x94   :  { %v149_v35 = vrot.slane %v148_v32, 1 }
  0x96   :  { %v150_v37 = vmax.f32 %v148_v32, %v149_v35 }
  0x98   :  { %v153_v39 = vsel %vm152_vm5, %v137_v34, %v150_v37 }
  0x99   :  { %v155_v42 = vsel %vm154_vm6, %v153_v39, -inf }
  0x9a   :  { %vm163_vm8 = vcmp.gt.f32.partialorder %v155_v42, -inf }
  0x9b   :  { %286 = vmatmul.msk.f32.vlgmr.msra.gmra.mxu1 %vm163_vm8, %v155_v42 }
 0x118   :  { %v198_v62 = vpop.f32.mrf.mxu1 }
 0x119   :  { %v204_v63 = vmax.f32 %v198_v62, 0.0 }
 0x127   :  { %v83_v44 = vpop.trf.xlu0 }
 0x128   :  { %285 = vmatmul.msk.f32.vlgmr.msra.gmra.mxu0 %vm99_vm7, %v83_v44 }
 0x130   :  { %238 = vmatmul.f32.vlgmr.msrb.gmra.mxu0 %v204_v63 }
 0x1a5   :  { %v120_v61 = vpop.f32.mrf.mxu0 }
 0x1a6   :  { %200 = vmatmul.f32.vlgmr.msra.gmra.mxu3 %v120_v61 }
 0x1ad   :  { %v239_v2 = vpop.f32.mrf.mxu0 }
 0x229   :  { %v201_v0 = vpop.f32.mrf.mxu3 }
 0x22a   :  { %v205_v1 = vmax.f32 %v201_v0, 0.0 }
 0x22c   :  { %241 = vmatmul.f32.vlgmr.msra.gmra.mxu2 %v205_v1 }
 0x2af   :  { %v242_v3 = vpop.f32.mrf.mxu2 }
 0x2b0   :  { %v245_v4 = vadd.f32 %v242_v3, %v239_v2 }
 0x2b2   :  { %v287_v5 = vmul.f32 -1.442695, %v245_v4 }
 0x2b4   :  { %329 = vpow2.f32 %v287_v5 }
 0x2ba   :  { %v330_v6 = vpop.eup %329 }
 0x2bb   :  { %v249_v7 = vadd.f32 1.0, %v330_v6 }
 0x2bd   :  { %331 = vrcp.f32 %v249_v7  ;;  %v261_v11 = vand.u32 2147483648, %v249_v7  ;;  %v259_v13 = vand.u32 2147483647, %v249_v7  ;;  %vm255_vm10 = vweird.f32 %v249_v7 }
 0x2bf   :  { %v262_v15 = vor.u32 1.1754944e-38, %v261_v11  ;;  %vm260_vm12 = vcmp.eq.f32.partialorder %v259_v13, 8.507059e+37 }
 0x2c3   :  { %v332_v8 = vpop.eup %331 }
 0x2c4   :  { %v251_v9 = vmul.f32 %v332_v8, %v249_v7  ;;  %vm256_vm9 = vweird.f32 %v332_v8 }
 0x2c5   :  { %vm257_vm11 = vmor %vm255_vm10, %vm256_vm9 }
 0x2c6   :  { %v252_v10 = vsub.f32 1.0, %v251_v9 }
 0x2c8   :  { %v253_v12 = vmul.f32 %v332_v8, %v252_v10 }
 0x2ca   :  { %v254_v14 = vadd.f32 %v332_v8, %v253_v12 }
 0x2cc   :  { %v258_v16 = vsel %vm257_vm11, %v332_v8, %v254_v14 }
 0x2cd   :  { %v263_v17 = vsel %vm260_vm12, %v262_v15, %v258_v16 }
 0x2ce   :  { %265 = vst [vmem:[#allocation9] sm:$0xff] %v263_v17 }
 0x2cf   :  { %276 = dma.vmem_to_hbm [thread:$0]  %s272_s1, 128, %s274_s5, [#allocation6]  }
 0x2d0   :  { %409 = dma.done.wait [#allocation6], 128  }
 0x2d1   :  { %410 = vsyncadd [#allocation6], 4294967168 }
 0x2d2   :  { %281 = vsyncpa [#allocation5], 1 }
 0x2d3   :  { %282 = vsyncpa [#allocation8], 1 }
 0x2d4   :  { %283 = vsyncpa [#allocation6], 1 }

</bundles_post_ra>
